<compile_context>
chip_gen: v6e
topology: v6e:2x2x1
jax: 0.10.0
libtpu: 0.0.40
codegen_flags: <defaults>
</compile_context>

<pallas_src>
import jax
import jax.numpy as jnp
from jax.experimental import pallas as pl
from jax.experimental.pallas import tpu as pltpu


_SUBLANE = 16  # bf16 sublane packing; also valid row alignment for f32 tiles


def _residual_mlp_kernel(x_ref, w1_ref, b1_ref, w2_ref, b2_ref, o_ref, acc_ref):
    """One (TM, D) row tile x one TH hidden chunk of
         o = (gelu(x @ W1 + b1) @ W2 + b2) + x.
    The hidden axis is the innermost ("arbitrary") grid axis; partial products
    accumulate into an f32 VMEM scratch; bias + residual applied on last step.
    """
    h_step = pl.program_id(1)

    @pl.when(h_step == 0)
    def _init():
        acc_ref[...] = jnp.zeros_like(acc_ref)

    x = x_ref[...]                                              # (TM, D)
    # First matmul (MXU, f32 accumulate) + bias + tanh-GELU for this chunk.
    h = jnp.dot(x, w1_ref[...], preferred_element_type=jnp.float32)
    h = jax.nn.gelu(h + b1_ref[...].astype(jnp.float32), approximate=True)
    # Second matmul: accumulate this chunk's contribution to the output tile.
    acc_ref[...] += jnp.dot(h.astype(w2_ref.dtype), w2_ref[...],
                            preferred_element_type=jnp.float32)

    @pl.when(h_step == pl.num_programs(1) - 1)
    def _finalize():
        y = acc_ref[...] + b2_ref[...].astype(jnp.float32) + x.astype(jnp.float32)
        o_ref[...] = y.astype(o_ref.dtype)


def _round_up(n, m):
    return ((n + m - 1) // m) * m


def _physical_vmem_bytes():
    """Best-effort physical VMEM per TensorCore (128 MiB v5e/v6e, 64 MiB v7x)."""
    try:
        cap = getattr(pltpu.get_tpu_info(), "vmem_capacity_bytes", None)
        if cap:
            return int(cap)
    except Exception:
        pass
    try:
        kind = jax.devices()[0].device_kind.lower()
        if "v5" in kind or "v6" in kind:
            return 128 * 1024 * 1024
    except Exception:
        pass
    return 64 * 1024 * 1024  # conservative (v7x per-TC VMEM)


def _choose_tiles(M, D, H, itemsize, budget):
    """Pick (block_m, block_h).  Priorities:
       (1) keep weights fully resident (th == H) whenever possible,
       (2) keep the row tile large enough to hide weight streaming,
       (3) leave at least two row tiles for megacore (v7x)."""
    m_aligned = _round_up(M, _SUBLANE)

    def weight_bytes(th):
        # W1 (D,th), W2 (th,D), b1 (th), b2 (D); x2 for pipeliner double-buffers.
        return 2 * (2 * D * th + th + D) * itemsize

    def act_bytes(tm, th):
        io = 2 * 2 * tm * D * itemsize        # x + out tiles, double-buffered
        acc = tm * D * 4                      # f32 accumulator scratch
        hid = tm * th * (4 + itemsize)        # f32 hidden + its bf16 MXU copy
        return io + acc + hid

    # (1) Only split the hidden axis if weights cannot fit next to a ~256-row
    # activation set; splitting re-streams 2*D*H bytes per row tile.
    tm_floor = min(256, max(_SUBLANE, m_aligned))
    th = H
    while (th > 128 and th % 256 == 0
           and weight_bytes(th) + act_bytes(tm_floor, th) > budget):
        th //= 2

    # (2) Grow the row tile as large as the remaining budget allows; by
    # construction it never drops below ~256 rows unless th is already 128.
    tm = 1024
    while tm > _SUBLANE and weight_bytes(th) + act_bytes(tm, th) > budget:
        tm //= 2
    tm = min(tm, m_aligned)

    # (3) Megacore: ensure >= 2 row tiles so the second TC (v7x) gets work.
    if tm >= m_aligned and m_aligned > _SUBLANE:
        tm = _round_up((m_aligned + 1) // 2, _SUBLANE)

    return tm, th


def residual_add_mlp(x, w1, b1, w2, b2, *, block_m=None, block_h=None,
                     vmem_budget_bytes=None, donate_input=False):
    """ResidualAdd(fn)(x) with fn = Linear -> GELU -> Linear, fused in Pallas.

    x: (B, S, D); w1: (D, H); b1: (H,); w2: (H, D); b2: (D,).
    Weights stored so y = x @ W + b (PyTorch nn.Linear weight pre-transposed).
    """
    B, S, D = x.shape
    H = w1.shape[1]
    assert D % 128 == 0, "pad d_model to a multiple of 128 for lane-dense tiles"
    assert H % 128 == 0, "pad hidden dim to a multiple of 128"
    # (256-multiples for D / block_h fill the 2x256^2 MXU on v6e/v7x.)

    M = B * S
    itemsize = jnp.dtype(x.dtype).itemsize

    phys_vmem = _physical_vmem_bytes()
    if vmem_budget_bytes is None:
        vmem_budget_bytes = (100 << 20) if phys_vmem >= (100 << 20) else (46 << 20)

    tm_auto, th_auto = _choose_tiles(M, D, H, itemsize, vmem_budget_bytes)
    tm = block_m or tm_auto
    th = block_h or th_auto
    assert tm % _SUBLANE == 0 and H % th == 0 and th % 128 == 0

    # Pad rows so M is a multiple of the row tile (padded rows sliced off).
    Mp = _round_up(M, tm)
    x2d = x.reshape(M, D)
    if Mp != M:
        x2d = jnp.pad(x2d, ((0, Mp - M), (0, 0)))
    b1_2d = b1.reshape(1, H)
    b2_2d = b2.reshape(1, D)

    nh = H // th
    n_row = Mp // tm
    grid = (n_row, nh)

    # Serpentine hidden traversal when H is split: forward on even row tiles,
    # reverse on odd ones -> the weight chunk at each row-tile boundary is
    # reused instead of re-fetched.
    if nh > 1:
        def h_ser(i, h):
            return h + (i % 2) * (nh - 1 - 2 * h)
    else:
        def h_ser(i, h):
            return h

    # Advisory cost estimate reflecting actual HBM traffic: weights are
    # re-read once per row tile whenever the hidden axis is split.
    weight_reads = n_row if nh > 1 else 1
    cost = pl.CostEstimate(
        flops=4 * Mp * D * H,                               # two matmuls
        transcendentals=Mp * H,                             # GELU
        bytes_accessed=int(2 * Mp * D * itemsize            # x read + out write
                           + weight_reads * (2 * D * H + H) * itemsize
                           + D * itemsize),                 # b2
    )

    est_vmem = (2 * (2 * D * th + th + D) * itemsize        # weights (x2 buffers)
                + 4 * tm * D * itemsize                     # x/out double-buffered
                + tm * D * 4                                # f32 accumulator
                + tm * th * (4 + itemsize))                 # f32 hidden + bf16 copy
    vmem_limit = int(min(max(est_vmem + (8 << 20), 32 << 20),
                         phys_vmem - (8 << 20)))

    out = pl.pallas_call(
        _residual_mlp_kernel,
        out_shape=jax.ShapeDtypeStruct((Mp, D), x.dtype),
        grid_spec=pltpu.PrefetchScalarGridSpec(
            num_scalar_prefetch=0,
            grid=grid,
            in_specs=[
                pl.BlockSpec((tm, D), lambda i, h: (i, 0)),          # x tile
                pl.BlockSpec((D, th), lambda i, h: (0, h_ser(i, h))),  # W1 chunk
                pl.BlockSpec((1, th), lambda i, h: (0, h_ser(i, h))),  # b1 chunk
                pl.BlockSpec((th, D), lambda i, h: (h_ser(i, h), 0)),  # W2 chunk
                pl.BlockSpec((1, D), lambda i, h: (0, 0)),           # b2 resident
            ],
            out_specs=pl.BlockSpec((tm, D), lambda i, h: (i, 0)),
            scratch_shapes=[pltpu.VMEM((tm, D), jnp.float32)],
        ),
        compiler_params=pltpu.CompilerParams(
            dimension_semantics=("parallel", "arbitrary"),
            vmem_limit_bytes=vmem_limit,
        ),
        cost_estimate=cost,
        input_output_aliases=({0: 0} if donate_input else {}),
    )(x2d, w1, b1_2d, w2, b2_2d)

    if Mp != M:
        out = out[:M]
    return out.reshape(B, S, D)


if __name__ == "__main__":
    # Small but lane-dense shapes: batch=2, seq=64, d_model=128, hidden=512.
    B, S, D, H = 2, 64, 128, 512
    dtype = jnp.bfloat16   # bf16 operands feed the MXU; accumulation is f32

    key = jax.random.PRNGKey(0)
    kx, kw1, kb1, kw2, kb2 = jax.random.split(key, 5)

    x = jax.random.normal(kx, (B, S, D), jnp.float32).astype(dtype)
    w1 = (jax.random.normal(kw1, (D, H), jnp.float32) / jnp.sqrt(D)).astype(dtype)
    b1 = (jax.random.normal(kb1, (H,), jnp.float32) * 0.01).astype(dtype)
    w2 = (jax.random.normal(kw2, (H, D), jnp.float32) / jnp.sqrt(H)).astype(dtype)
    b2 = (jax.random.normal(kb2, (D,), jnp.float32) * 0.01).astype(dtype)

    # Reference with the same bf16-operand / f32-accumulate numerics (tanh GELU).
    xf = x.reshape(-1, D)
    h = jnp.dot(xf, w1, preferred_element_type=jnp.float32) + b1.astype(jnp.float32)
    h = jax.nn.gelu(h, approximate=True)
    y = jnp.dot(h.astype(dtype), w2, preferred_element_type=jnp.float32)
    ref = (y + b2.astype(jnp.float32) + xf.astype(jnp.float32)).astype(dtype)
    ref = ref.reshape(B, S, D)

    # 1) Auto tile selection: weights resident (th == H), >= 2 row tiles.
    out_auto = residual_add_mlp(x, w1, b1, w2, b2)
    jax.block_until_ready(out_auto)
    assert jnp.allclose(out_auto.astype(jnp.float32), ref.astype(jnp.float32),
                        atol=3e-2, rtol=3e-2), "auto-tile mismatch vs reference"

    # 2) Explicit small tiles to exercise the split-hidden accumulator and the
    #    serpentine weight traversal (grid = (2, 2)).
    out_split = residual_add_mlp(x, w1, b1, w2, b2, block_m=64, block_h=256)
    jax.block_until_ready(out_split)
    assert jnp.allclose(out_split.astype(jnp.float32), ref.astype(jnp.float32),
                        atol=3e-2, rtol=3e-2), "split-hidden mismatch vs reference"

    print("KERNEL_OK")
</pallas_src>

<mosaic_0001>
module attributes {stable_mosaic.version = 11 : i64} {
  func.func @_residual_mlp_kernel(%arg0: i32, %arg1: i32, %arg2: memref<64x128xbf16, #tpu.memory_space<vmem>>, %arg3: memref<128x512xbf16, #tpu.memory_space<vmem>>, %arg4: memref<1x512xbf16, #tpu.memory_space<vmem>>, %arg5: memref<512x128xbf16, #tpu.memory_space<vmem>>, %arg6: memref<1x128xbf16, #tpu.memory_space<vmem>>, %arg7: memref<64x128xbf16, #tpu.memory_space<vmem>>, %arg8: memref<64x128xf32, #tpu.memory_space<vmem>>) attributes {dimension_semantics = [#tpu.dimension_semantics<parallel>, #tpu.dimension_semantics<arbitrary>], iteration_bounds = array<i64: 2, 1>, scalar_prefetch = 0 : i64, scratch_operands = 1 : i64, tpu.core_type = #tpu.core_type<tc>, window_params = [{transform_indices = @transform_0, window_bounds = array<i64: 64, 128>}, {transform_indices = @transform_1, window_bounds = array<i64: 128, 512>}, {transform_indices = @transform_2, window_bounds = array<i64: 1, 512>}, {transform_indices = @transform_3, window_bounds = array<i64: 512, 128>}, {pipeline_mode = #tpu.pipeline_mode<synchronous>, transform_indices = @transform_4, window_bounds = array<i64: 1, 128>}, {transform_indices = @transform_5, window_bounds = array<i64: 64, 128>}]} {
    %c0_i32 = arith.constant 0 : i32
    %0 = arith.cmpi eq, %arg1, %c0_i32 : i32
    %1 = arith.extui %0 : i1 to i32
    %c0_i32_0 = arith.constant 0 : i32
    %2 = arith.cmpi ne, %1, %c0_i32_0 : i32
    scf.if %2 {
      %cst_19 = arith.constant 0.000000e+00 : f32
      %32 = vector.broadcast %cst_19 : f32 to vector<64x128xf32>
      %c0_20 = arith.constant 0 : index
      %c0_21 = arith.constant 0 : index
      %33 = vector.load %arg8[%c0_20, %c0_21] : memref<64x128xf32, #tpu.memory_space<vmem>>, vector<64x128xf32>
      tpu.vector_store %arg8[%c0_20, %c0_21], %32 {strides = array<i32>} : memref<64x128xf32, #tpu.memory_space<vmem>>, vector<64x128xf32>,
    } else {
    }
    %c0 = arith.constant 0 : index
    %c0_1 = arith.constant 0 : index
    %3 = vector.load %arg2[%c0, %c0_1] : memref<64x128xbf16, #tpu.memory_space<vmem>>, vector<64x128xbf16>
    %c0_2 = arith.constant 0 : index
    %c0_3 = arith.constant 0 : index
    %4 = vector.load %arg3[%c0_2, %c0_3] : memref<128x512xbf16, #tpu.memory_space<vmem>>, vector<128x512xbf16>
    %cst = arith.constant dense<0.000000e+00> : vector<64x512xf32>
    %5 = tpu.matmul %3, %4, %cst {dimension_numbers = #tpu.dot_dimension_numbers<[1], [0], [0], [1], [0, 0, 1, 1], [], []>} : vector<64x128xbf16>, vector<128x512xbf16>, vector<64x512xf32> -> vector<64x512xf32>
    %c0_4 = arith.constant 0 : index
    %c0_5 = arith.constant 0 : index
    %6 = vector.load %arg4[%c0_4, %c0_5] : memref<1x512xbf16, #tpu.memory_space<vmem>>, vector<1x512xbf16>
    %7 = arith.extf %6 : vector<1x512xbf16> to vector<1x512xf32>
    %8 = vector.broadcast %7 : vector<1x512xf32> to vector<64x512xf32>
    %9 = arith.addf %5, %8 : vector<64x512xf32>
    %10 = arith.mulf %9, %9 : vector<64x512xf32>
    %11 = arith.mulf %9, %10 : vector<64x512xf32>
    %cst_6 = arith.constant 4.471500e-02 : f32
    %12 = vector.broadcast %cst_6 : f32 to vector<64x512xf32>
    %13 = arith.mulf %12, %11 : vector<64x512xf32>
    %14 = arith.addf %9, %13 : vector<64x512xf32>
    %cst_7 = arith.constant 0.797884583 : f32
    %15 = vector.broadcast %cst_7 : f32 to vector<64x512xf32>
    %16 = arith.mulf %15, %14 : vector<64x512xf32>
    %17 = math.tanh %16 : vector<64x512xf32>
    %cst_8 = arith.constant 1.000000e+00 : f32
    %18 = vector.broadcast %cst_8 : f32 to vector<64x512xf32>
    %19 = arith.addf %18, %17 : vector<64x512xf32>
    %cst_9 = arith.constant 5.000000e-01 : f32
    %20 = vector.broadcast %cst_9 : f32 to vector<64x512xf32>
    %21 = arith.mulf %20, %19 : vector<64x512xf32>
    %22 = arith.mulf %9, %21 : vector<64x512xf32>
    %c0_10 = arith.constant 0 : index
    %c0_11 = arith.constant 0 : index
    %23 = vector.load %arg8[%c0_10, %c0_11] : memref<64x128xf32, #tpu.memory_space<vmem>>, vector<64x128xf32>
    %24 = arith.truncf %22 : vector<64x512xf32> to vector<64x512xbf16>
    %c0_12 = arith.constant 0 : index
    %c0_13 = arith.constant 0 : index
    %25 = vector.load %arg5[%c0_12, %c0_13] : memref<512x128xbf16, #tpu.memory_space<vmem>>, vector<512x128xbf16>
    %cst_14 = arith.constant dense<0.000000e+00> : vector<64x128xf32>
    %26 = tpu.matmul %24, %25, %cst_14 {dimension_numbers = #tpu.dot_dimension_numbers<[1], [0], [0], [1], [0, 0, 1, 1], [], []>} : vector<64x512xbf16>, vector<512x128xbf16>, vector<64x128xf32> -> vector<64x128xf32>
    %27 = arith.addf %23, %26 : vector<64x128xf32>
    %c0_15 = arith.constant 0 : index
    %c0_16 = arith.constant 0 : index
    %28 = vector.load %arg8[%c0_15, %c0_16] : memref<64x128xf32, #tpu.memory_space<vmem>>, vector<64x128xf32>
    tpu.vector_store %arg8[%c0_15, %c0_16], %27 {strides = array<i32>} : memref<64x128xf32, #tpu.memory_space<vmem>>, vector<64x128xf32>,
    %c0_i32_17 = arith.constant 0 : i32
    %29 = arith.cmpi eq, %arg1, %c0_i32_17 : i32
    %30 = arith.extui %29 : i1 to i32
    %c0_i32_18 = arith.constant 0 : i32
    %31 = arith.cmpi ne, %30, %c0_i32_18 : i32
    scf.if %31 {
      %c0_19 = arith.constant 0 : index
      %c0_20 = arith.constant 0 : index
      %32 = vector.load %arg8[%c0_19, %c0_20] : memref<64x128xf32, #tpu.memory_space<vmem>>, vector<64x128xf32>
      %c0_21 = arith.constant 0 : index
      %c0_22 = arith.constant 0 : index
      %33 = vector.load %arg6[%c0_21, %c0_22] : memref<1x128xbf16, #tpu.memory_space<vmem>>, vector<1x128xbf16>
      %34 = arith.extf %33 : vector<1x128xbf16> to vector<1x128xf32>
      %35 = vector.broadcast %34 : vector<1x128xf32> to vector<64x128xf32>
      %36 = arith.addf %32, %35 : vector<64x128xf32>
      %37 = arith.extf %3 : vector<64x128xbf16> to vector<64x128xf32>
      %38 = arith.addf %36, %37 : vector<64x128xf32>
      %39 = arith.truncf %38 : vector<64x128xf32> to vector<64x128xbf16>
      %c0_23 = arith.constant 0 : index
      %c0_24 = arith.constant 0 : index
      %40 = vector.load %arg7[%c0_23, %c0_24] : memref<64x128xbf16, #tpu.memory_space<vmem>>, vector<64x128xbf16>
      tpu.vector_store %arg7[%c0_23, %c0_24], %39 {strides = array<i32>} : memref<64x128xbf16, #tpu.memory_space<vmem>>, vector<64x128xbf16>,
    } else {
    }
    return
  }
  func.func @transform_0(%arg0: i32, %arg1: i32) -> (i32, i32) {
    %c0_i32 = arith.constant 0 : i32
    %c0_i32_0 = arith.constant 0 : i32
    return %arg0, %c0_i32 : i32, i32
  }
  func.func @transform_1(%arg0: i32, %arg1: i32) -> (i32, i32) {
    %c0_i32 = arith.constant 0 : i32
    %c0_i32_0 = arith.constant 0 : i32
    return %c0_i32, %arg1 : i32, i32
  }
  func.func @transform_2(%arg0: i32, %arg1: i32) -> (i32, i32) {
    %c0_i32 = arith.constant 0 : i32
    %c0_i32_0 = arith.constant 0 : i32
    return %c0_i32, %arg1 : i32, i32
  }
  func.func @transform_3(%arg0: i32, %arg1: i32) -> (i32, i32) {
    %c0_i32 = arith.constant 0 : i32
    %c0_i32_0 = arith.constant 0 : i32
    return %arg1, %c0_i32 : i32, i32
  }
  func.func @transform_4(%arg0: i32, %arg1: i32) -> (i32, i32) {
    %c0_i32 = arith.constant 0 : i32
    %c0_i32_0 = arith.constant 0 : i32
    %c0_i32_1 = arith.constant 0 : i32
    return %c0_i32, %c0_i32_0 : i32, i32
  }
  func.func @transform_5(%arg0: i32, %arg1: i32) -> (i32, i32) {
    %c0_i32 = arith.constant 0 : i32
    %c0_i32_0 = arith.constant 0 : i32
    return %arg0, %c0_i32 : i32, i32
  }
}

</mosaic_0001>

<bundles_post_ra>
// kernel: tpu_custom_call.1
= control target key start
LH: loop header
LB: loop body
LE: loop exit
PB: predicated region body
PF: predicated region fallthrough
CT: control target
= control target key end

     0   :  { %s2972_s0 = inlined_call_operand.hbm [shape: bf16[128,128], index: 0, kind: input, shape index: {}]   ;;  %s2973_s1 = inlined_call_operand.hbm [shape: bf16[128,512], index: 1, kind: input, shape index: {}]   ;;  %s2974_s2 = inlined_call_operand.hbm [shape: bf16[1,512], index: 2, kind: input, shape index: {}]   ;;  %s2975_s3 = inlined_call_operand.hbm [shape: bf16[512,128], index: 3, kind: input, shape index: {}]   ;;  %s2976_s4 = inlined_call_operand.vmem [shape: bf16[1,128], index: 4, kind: input, shape index: {}]   ;;  %s2977_s5 = inlined_call_operand.hbm [shape: bf16[128,128], index: 5, kind: output, shape index: {}]  }
   0x1   :  { %2987 = sst [smem:[#allocation19_spill]] %s2973_s1 }
   0x2   :  { %10 = vsyncpa [#allocation4], 0 }
   0x3   :  { %12 = vsyncpa [#allocation4 + $0x1], 0 }
   0x4   :  { %13 = vsyncpa [#allocation7], 0 }
   0x5   :  { %14 = vsyncpa [#allocation10], 0 }
   0x6   :  { %15 = vsyncpa [#allocation5], 0 }
   0x7   :  { %17 = vsyncpa [#allocation5 + $0x1], 0  ;;  %s2377_s18 = smov 0   ;;  %s2379_s19 = smov 0  }
   0x8   :  { %s2381_s20 = smov 0   ;;  %s2383_s21 = smov 0  }
   0x9   :  { %s2385_s22 = smov 0   ;;  %s2387_s23 = smov 0  }
   0xa LB: > { %s1673_s24 = sadd.s32 4294967295, %s2333_s23   ;;  %s1674_s25 = sadd.s32 4294967294, %s2333_s23   ;;  %s2333_s23 = sphi %s2387_s23, %s23_s23   ;;  %s2329_s22 = sphi %s2385_s22, %s3016_s22   ;;  %s2325_s21 = sphi %s2383_s21, %s3015_s21   ;;  %s2321_s20 = sphi %s2381_s20, %s3014_s20   ;;  %s2317_s19 = sphi %s2379_s19, %s3013_s19   ;;  %s2313_s18 = sphi %s2377_s18, %s3012_s18  }
   0xb   : > { %p55_p0 = scmp.ne.s32.totalorder %s2317_s19, %s2313_s18  ;;  %p2411_p1 = scmp.eq.s32.totalorder %s1673_s24, 0 }
   0xc   : > { %p2415_p2 = scmp.eq.s32.totalorder %s1673_s24, 1  ;;  %p184_p3 = scmp.eq.s32.totalorder %s1674_s25, 1 }
   0xd   : > { %s2988_s26 = scalar_select %p2411_p1, 1, 0 }
   0xe   : > { %p2421_p4 = por %p2411_p1, %p55_p0  ;;  %p1675_p5 = scmp.ge.s32.totalorder %s2333_s23, 1 }
   0xf   : > { %p2426_p6 = por %p184_p3, %p55_p0  ;;  %p191_p7 = scmp.lt.s32.totalorder %s2333_s23, 3 }
  0x10   : > { %s2990_s28 = scalar_select %p2421_p4, 1, 0 }
  0x11   : > { %s2991_s29 = scalar_select %p2426_p6, 1, 0 }
  0x12   : > { %p2431_p8 = pnand %p1675_p5, %p191_p7  ;;  %s2335_s6 = smov [#allocation6]  }
  0x13   : > { %s206_s7 = sshll.u32 %s2335_s6, 4  ;;  %s2336_s9 = smov [#allocation8]   ;;  %s207_s7 = int_to_ptr.vmem [resolvable:$true] %s206_s7 }
  0x14   : > { %s2992_s30 = scalar_select %p2431_p8, 1, 0 }
  0x15   : > { %p1899_p9 = pneg %p2431_p8  ;;  %s223_s10 = sshll.u32 %s2336_s9, 4  ;;  %s224_s10 = int_to_ptr.vmem [resolvable:$true] %s223_s10 }
  0x16   : > { %s2337_s11 = smov [#allocation9]   ;;  %s2150_s13 = scalar_lea.vmem %s207_s7, 4096 }
  0x17   : > { %p2440_p11 = pnand %p1899_p9, %p2411_p1  ;;  %s236_s12 = sshll.u32 %s2337_s11, 4  ;;  %s237_s12 = int_to_ptr.vmem [resolvable:$true] %s236_s12 }
  0x18   : > { %p2151_p13 = scmp.ne.s32.totalorder %s207_s7, %s2150_s13  ;;  %p2158_p5 = scmp.lt.s32.totalorder %s207_s7, %s207_s7 }
  0x19   : > { %p2141_p12 = pneg %p2440_p11  ;;  %p2159_p7 = scmp.lt.s32.totalorder %s2150_s13, %s2150_s13 }
  0x1b   : > { %p2153_p0 = pnand %p2151_p13, %p2141_p12  ;;  %p2160_p9 = por %p2159_p7, %p2158_p5 }
  0x1d   : > { %p2154_p3 = pneg %p2153_p0 }
  0x1f   : > { %p2161_p10 = pnand %p2160_p9, %p2154_p3 }
  0x21   : > { %2164 = shalt.err (!%p2161_p10)
}
  0x22   : > { %s2338_s14 = smov 256   ;;  %s2339_s15 = smov 16  }
  0x23   : > { %s2994_s1 = sld [smem:[#allocation19_spill]]  ;;  %s2176_s24 = scalar_lea.vmem %s224_s10, 64 }
  0x24   : > { %p2177_p6 = scmp.ne.s32.totalorder %s224_s10, %s2176_s24  ;;  %p2184_p1 = scmp.lt.s32.totalorder %s224_s10, %s224_s10 }
  0x25   : > { %p2185_p4 = scmp.lt.s32.totalorder %s2176_s24, %s2176_s24 }
  0x26   : > { %p2179_p13 = pnand %p2177_p6, %p2141_p12 }
  0x27   : > { %p2186_p5 = por %p2185_p4, %p2184_p1 }
  0x28   : > { %p2180_p0 = pneg %p2179_p13 }
  0x29   : > { %1902 = dma.hbm_to_vmem [thread:$0]  (!%p2440_p11), %s2994_s1, 4096, %s207_s7, [#allocation7], %s2338_s14, %s2338_s14, %s2339_s15  }
  0x2a   : > { %p2187_p3 = pnand %p2186_p5, %p2180_p0 }
  0x2c   : > { %2190 = shalt.err (!%p2187_p3)
}
  0x2d   : > { %1905 = dma.hbm_to_vmem [thread:$0]  (!%p2440_p11), %s2974_s2, 64, %s224_s10, [#allocation7]  }
  0x2e   : > { %s2202_s7 = scalar_lea.vmem %s237_s12, 4096  ;;  %p2210_p9 = scmp.lt.s32.totalorder %s237_s12, %s237_s12 }
  0x2f   : > { %p2203_p10 = scmp.ne.s32.totalorder %s237_s12, %s2202_s7  ;;  %p2211_p13 = scmp.lt.s32.totalorder %s2202_s7, %s2202_s7 }
  0x31   : > { %p2205_p7 = pnand %p2203_p10, %p2141_p12  ;;  %p2212_p8 = por %p2211_p13, %p2210_p9 }
  0x33   : > { %p2206_p6 = pneg %p2205_p7 }
  0x35   : > { %p2213_p1 = pnand %p2212_p8, %p2206_p6 }
  0x37   : > { %2216 = shalt.err (!%p2213_p1)
}
  0x38   : > { %s2982_s9 = smov 64   ;;  %s2983_s10 = smov 4  }
  0x39   : > { %1908 = dma.hbm_to_vmem [thread:$0]  (!%p2440_p11), %s2975_s3, 4096, %s237_s12, [#allocation10], %s2982_s9, %s2982_s9, %s2983_s10  }
  0x3a   : > { %s42_s14 = sadd.s32 1, %s2321_s20  ;;  %s35_s15 = sadd.s32 1, %s2329_s22 }
  0x3b   : > { %p49_p4 = scmp.ne.s32.totalorder %s2321_s20, %s2317_s19  ;;  %p37_p8 = scmp.ge.s32.totalorder %s35_s15, 2 }
  0x3c   : > { %p50_p12 = scmp.eq.s32.totalorder %s2333_s23, 0  ;;  %p1920_p5 = scmp.lt.s32.totalorder %s2333_s23, 2 }
  0x3d   : > { %p2480_p0 = por %p2415_p2, %p49_p4  ;;  %s3018_s15 = smov (%p37_p8, %s35_s15), 0 }
  0x3e   : > { %p51_p3 = por %p50_p12, %p49_p4  ;;  %s253_s8 = sand.u32 1, %s2321_s20  }
  0x3f   : > { %s39_s17 = ssub.s32 %s2329_s22, %s3018_s15  ;;  %s1680_s12 = sshll.u32 %s253_s8, 5 }
  0x40   : > { %p40_p10 = scmp.eq.s32.totalorder %s39_s17, 0  ;;  %s1770_s24 = sshll.u32 %s2329_s22, 9 }
  0x41   : > { %s263_s27 = scalar_lea.hbm %s2972_s0, %s1770_s24  ;;  %s257_s11 = scalar_lea.vmem [#allocation3], %s1680_s12 }
  0x42   : > { %s2492_s25 = scalar_select %p40_p10, %s2321_s20, %s42_s14  }
  0x43   : > { %s264_s13 = sshll.u32 %s257_s11, 4  ;;  %p2499_p2 = pnand %p1920_p5, %p51_p3  ;;  %s265_s13 = int_to_ptr.vmem [resolvable:$true] %s264_s13 }
  0x44   : > { %s254_s10 = scalar_lea.sflag [#allocation4], %s253_s8  ;;  %s2230_s17 = scalar_lea.vmem %s265_s13, 512 }
  0x45   : > { %p2219_p11 = pneg %p2499_p2  ;;  %p2231_p7 = scmp.ne.s32.totalorder %s265_s13, %s2230_s17 }
  0x46   : > { %s2342_s14 = smov [#allocation3]  }
  0x47   : > { %p2233_p6 = pnand %p2231_p7, %p2219_p11  ;;  %s2235_s1 = sshll.u32 %s2342_s14, 4  ;;  %s2236_s1 = int_to_ptr.vmem [resolvable:$false] %s2235_s1 }
  0x48   : > { %s2237_s24 = scalar_lea.vmem %s2236_s1, 1024  ;;  %p2238_p13 = scmp.lt.s32.totalorder %s265_s13, %s2236_s1 }
  0x49   : > { %p2234_p9 = pneg %p2233_p6  ;;  %p2239_p1 = scmp.lt.s32.totalorder %s2237_s24, %s2230_s17 }
  0x4b   : > { %p2240_p4 = por %p2239_p1, %p2238_p13 }
  0x4d   : > { %p2241_p8 = pnand %p2240_p4, %p2234_p9 }
  0x4f   : > { %2244 = shalt.err (!%p2241_p8)
}
  0x50   : > { %s2997_s12 = smov 4   ;;  %s2998_s6 = smov 64  }
  0x51   : > { %1912 = dma.hbm_to_vmem [thread:$0]  (!%p2499_p2), %s263_s27, 512, %s265_s13, %s254_s10, %s2998_s6, %s2998_s6, %s2997_s12  }
  0x52   : > { %p2999_p12 = scmp.ne.s32.totalorder %s2992_s30, 0 }
  0x54   : > { %276 = sbr.rel (%p2999_p12) target bundleno = 645 (0x285), region = 40 }
  0x59   : > { %s2513_s8 = sand.u32 1, %s2317_s19   ;;  %p3000_p5 = scmp.ne.s32.totalorder %s2990_s28, 0 }
  0x5a   : > { %s1684_s1 = sshll.u32 %s2513_s8, 5  ;;  %s279_s7 = scalar_lea.sflag [#allocation4], %s2513_s8 }
  0x5b   : > { %s2519_s11 = scalar_lea.vmem [#allocation3], %s1684_s1 }
  0x5c   : > { %2296 = dma.done.wait (%p3000_p5), %s279_s7, 512  }
  0x5d   : > { %2298 = vsyncadd (%p3000_p5), %s279_s7, 4294966784  ;;  %p3001_p3 = scmp.ne.s32.totalorder %s2988_s26, 0 }
  0x5f   : > { %2300 = dma.done.wait (%p3001_p3), [#allocation7], 4160  }
  0x60   : > { %2302 = vsyncadd (%p3001_p3), [#allocation7], 4294963136 }
  0x61   : > { %2304 = dma.done.wait (%p3001_p3), [#allocation10], 4096  }
  0x62   : > { %2306 = vsyncadd (%p3001_p3), [#allocation10], 4294963200  ;;  %v2343_v0 = vmov 0   ;;  %v1983_v1 = vld [vmem:[#allocation6 + $0xe4] ss:$16 sps:$4 sm:$0xff]   ;;  %v341_v34 = vld [vmem:[%s2519_s11 + $0x8] sm:$0xff]  }
  0x63   : > { %634 = vmatprep.mubr.bf16.mxu0 %v2343_v0  ;;  %707 = vmatprep.mubr.bf16.mxu1 %v2343_v0  ;;  %v1985_v2 = vld [vmem:[#allocation6 + $0xec] ss:$16 sps:$4 sm:$0xff]   ;;  %v1987_v3 = vld [vmem:[#allocation6 + $0xe0] ss:$16 sps:$4 sm:$0xff]   ;;  %v1988_v4 = vld [vmem:[#allocation6 + $0xe8] ss:$16 sps:$4 sm:$0xff]  }
  0x64   : > { %602 = vmatprep.subr.bf16.mxu0 %v1983_v1  ;;  %675 = vmatprep.subr.bf16.mxu1 %v1985_v2  ;;  %v1989_v5 = vld [vmem:[#allocation6 + $0xc4] ss:$16 sps:$4 sm:$0xff]   ;;  %v1991_v6 = vld [vmem:[#allocation6 + $0xcc] ss:$16 sps:$4 sm:$0xff]   ;;  %v1993_v7 = vld [vmem:[#allocation6 + $0xc0] ss:$16 sps:$4 sm:$0xff]  }
  0x65   : > { %603 = vmatpush1.bf16.msra.mxu0 %v1987_v3  ;;  %676 = vmatpush1.bf16.msra.mxu1 %v1988_v4  ;;  %v1994_v8 = vld [vmem:[#allocation6 + $0xc8] ss:$16 sps:$4 sm:$0xff]   ;;  %v1995_v9 = vld [vmem:[#allocation6 + $0xa4] ss:$16 sps:$4 sm:$0xff]   ;;  %v1997_v10 = vld [vmem:[#allocation6 + $0xac] ss:$16 sps:$4 sm:$0xff]  }
  0x66   : > { %604 = vmatprep.subr.bf16.mxu0 %v1989_v5  ;;  %677 = vmatprep.subr.bf16.mxu1 %v1991_v6  ;;  %v1999_v11 = vld [vmem:[#allocation6 + $0xa0] ss:$16 sps:$4 sm:$0xff]   ;;  %v2000_v12 = vld [vmem:[#allocation6 + $0xa8] ss:$16 sps:$4 sm:$0xff]   ;;  %v2001_v13 = vld [vmem:[#allocation6 + $0x84] ss:$16 sps:$4 sm:$0xff]   ;;  %v382_v5 = vlaneseq }
  0x67   : > { %v2003_v14 = vld [vmem:[#allocation6 + $0x8c] ss:$16 sps:$4 sm:$0xff]   ;;  %v2005_v15 = vld [vmem:[#allocation6 + $0x80] ss:$16 sps:$4 sm:$0xff]   ;;  %v2006_v16 = vld [vmem:[#allocation6 + $0x88] ss:$16 sps:$4 sm:$0xff]  }
  0x68   : > { %v2007_v17 = vld [vmem:[#allocation6 + $0x64] ss:$16 sps:$4 sm:$0xff]   ;;  %v2009_v18 = vld [vmem:[#allocation6 + $0x6c] ss:$16 sps:$4 sm:$0xff]   ;;  %v2011_v19 = vld [vmem:[#allocation6 + $0x60] ss:$16 sps:$4 sm:$0xff]  }
  0x69   : > { %605 = vmatpush1.bf16.msra.mxu0 %v1993_v7  ;;  %678 = vmatpush1.bf16.msra.mxu1 %v1994_v8  ;;  %v2012_v20 = vld [vmem:[#allocation6 + $0x68] ss:$16 sps:$4 sm:$0xff]   ;;  %v2013_v21 = vld [vmem:[#allocation6 + $0x44] ss:$16 sps:$4 sm:$0xff]   ;;  %v2015_v22 = vld [vmem:[#allocation6 + $0x4c] ss:$16 sps:$4 sm:$0xff]  }
  0x6a   : > { %606 = vmatprep.subr.bf16.mxu0 %v1995_v9  ;;  %679 = vmatprep.subr.bf16.mxu1 %v1997_v10  ;;  %v2017_v23 = vld [vmem:[#allocation6 + $0x40] ss:$16 sps:$4 sm:$0xff]   ;;  %v2018_v24 = vld [vmem:[#allocation6 + $0x48] ss:$16 sps:$4 sm:$0xff]   ;;  %v2019_v25 = vld [vmem:[#allocation6 + $0x24] ss:$16 sps:$4 sm:$0xff]  }
  0x6b   : > { %v2021_v26 = vld [vmem:[#allocation6 + $0x2c] ss:$16 sps:$4 sm:$0xff]   ;;  %v2023_v27 = vld [vmem:[#allocation6 + $0x20] ss:$16 sps:$4 sm:$0xff]   ;;  %v2024_v28 = vld [vmem:[#allocation6 + $0x28] ss:$16 sps:$4 sm:$0xff]  }
  0x6c   : > { %v2025_v29 = vld [vmem:[#allocation6 + $0x4] ss:$16 sps:$4 sm:$0xff]   ;;  %v2027_v30 = vld [vmem:[#allocation6 + $0xc] ss:$16 sps:$4 sm:$0xff]   ;;  %v2029_v31 = vld [vmem:[#allocation6] ss:$16 sps:$4 sm:$0xff]  }
  0x6d   : > { %607 = vmatpush1.bf16.msra.mxu0 %v1999_v11  ;;  %680 = vmatpush1.bf16.msra.mxu1 %v2000_v12  ;;  %v2030_v32 = vld [vmem:[#allocation6 + $0x8] ss:$16 sps:$4 sm:$0xff]   ;;  %v339_v33 = vld [vmem:[%s2519_s11] sm:$0xff]   ;;  %v343_v35 = vld [vmem:[%s2519_s11 + $0x10] sm:$0xff]   ;;  %v383_v6 = vshrl.u32 %v382_v5, 7  ;;  %s2903_s30 = scalar_lea.vmem [#allocation11], %s1684_s1 }
  0x6e   : > { %608 = vmatprep.subr.bf16.mxu0 %v2001_v13  ;;  %681 = vmatprep.subr.bf16.mxu1 %v2003_v14  ;;  %v345_v36 = vld [vmem:[%s2519_s11 + $0x18] sm:$0xff]   ;;  %v2043_v45 = vld [vmem:[#allocation9 + $0x68] sm:$0xff]   ;;  %v2047_v49 = vld [vmem:[#allocation9 + $0x60] sm:$0xff]   ;;  %s1779_s9 = sshll.u32 %s2325_s21, 9  ;;  %s1557_s10 = sshll.u32 %s2903_s30, 4  ;;  %s2923_s10 = int_to_ptr.vmem [resolvable:$true] %s1557_s10 }
  0x6f   : > { %v2035_v37 = vld [vmem:[#allocation9 + $0x78] sm:$0xff]   ;;  %v2039_v41 = vld [vmem:[#allocation9 + $0x70] sm:$0xff]   ;;  %v2044_v46 = vld [vmem:[#allocation9 + $0xe8] sm:$0xff]   ;;  %v2545_v9 = vsub.s32 0, %v383_v6  ;;  %v392_v10 = vsub.s32 4, %v383_v6  ;;  %v388_v11 = vsub.s32 2, %v383_v6  ;;  %s2921_s17 = scalar_lea.hbm %s2977_s5, %s1779_s9 }
  0x70   : > { %v2036_v38 = vld [vmem:[#allocation9 + $0xf8] sm:$0xff]   ;;  %v2040_v42 = vld [vmem:[#allocation9 + $0xf0] sm:$0xff]   ;;  %v2045_v47 = vld [vmem:[#allocation9 + $0x28] sm:$0xff]   ;;  %v396_v12 = vsub.s32 6, %v383_v6  ;;  %s1544_s14 = scalar_lea.sflag [#allocation5], %s2513_s8  ;;  %s2245_s24 = scalar_lea.vmem %s2923_s10, 512 }
  0x71   : > { %609 = vmatpush1.bf16.msra.mxu0 %v2005_v15  ;;  %682 = vmatpush1.bf16.msra.mxu1 %v2006_v16  ;;  %v2037_v39 = vld [vmem:[#allocation9 + $0x38] sm:$0xff]   ;;  %v2041_v43 = vld [vmem:[#allocation9 + $0x30] sm:$0xff]   ;;  %v2046_v48 = vld [vmem:[#allocation9 + $0xa8] sm:$0xff]   ;;  %3002 = vst [vmem:[#allocation16_spill] sm:$0xff] %v2545_v9  ;;  %p2246_p10 = scmp.ne.s32.totalorder %s2923_s10, %s2245_s24  ;;  %s2344_s21 = smov [#allocation11]  }
  0x72   : > { %610 = vmatprep.subr.bf16.mxu0 %v2007_v17  ;;  %683 = vmatprep.subr.bf16.mxu1 %v2009_v18  ;;  %v2038_v40 = vld [vmem:[#allocation9 + $0xb8] sm:$0xff]   ;;  %v2042_v44 = vld [vmem:[#allocation9 + $0xb0] sm:$0xff]   ;;  %v2048_v50 = vld [vmem:[#allocation9 + $0xe0] sm:$0xff]   ;;  %s2249_s12 = sshll.u32 %s2344_s21, 4  ;;  %s2250_s12 = int_to_ptr.vmem [resolvable:$false] %s2249_s12 }
  0x73   : > { %v2049_v51 = vld [vmem:[#allocation9 + $0x20] sm:$0xff]   ;;  %v2051_v53 = vld [vmem:[#allocation9 + $0x58] sm:$0xff]   ;;  %v2055_v57 = vld [vmem:[#allocation9 + $0x50] sm:$0xff]   ;;  %p2247_p2 = pnand %p2246_p10, %p2480_p0  ;;  %s2251_s6 = scalar_lea.vmem %s2250_s12, 1024 }
  0x74   : > { %v2050_v52 = vld [vmem:[#allocation9 + $0xa0] sm:$0xff]   ;;  %v2052_v54 = vld [vmem:[#allocation9 + $0xd8] sm:$0xff]   ;;  %v2056_v58 = vld [vmem:[#allocation9 + $0xd0] sm:$0xff]   ;;  %p2252_p7 = scmp.lt.s32.totalorder %s2923_s10, %s2250_s12  ;;  %p2253_p6 = scmp.lt.s32.totalorder %s2251_s6, %s2245_s24 }
  0x75   : > { %611 = vmatpush1.bf16.msra.mxu0 %v2011_v19  ;;  %684 = vmatpush1.bf16.msra.mxu1 %v2012_v20  ;;  %v2053_v55 = vld [vmem:[#allocation9 + $0x18] sm:$0xff]   ;;  %v2057_v59 = vld [vmem:[#allocation9 + $0x10] sm:$0xff]   ;;  %v2059_v61 = vld [vmem:[#allocation9 + $0x48] sm:$0xff]   ;;  %p2248_p11 = pneg %p2247_p2 }
  0x76   : > { %612 = vmatprep.subr.bf16.mxu0 %v2013_v21  ;;  %685 = vmatprep.subr.bf16.mxu1 %v2015_v22  ;;  %v2054_v56 = vld [vmem:[#allocation9 + $0x98] sm:$0xff]   ;;  %v2058_v60 = vld [vmem:[#allocation9 + $0x90] sm:$0xff]   ;;  %v2060_v62 = vld [vmem:[#allocation9 + $0xc8] sm:$0xff]   ;;  %p2254_p9 = por %p2253_p6, %p2252_p7 }
  0x77   : > { %v2061_v63 = vld [vmem:[#allocation9 + $0x8] sm:$0xff]   ;;  %v2063_v1 = vld [vmem:[#allocation9 + $0x40] sm:$0xff]   ;;  %v379_v7 = vld [vmem:[#allocation8] sm:$0xf] }
  0x78   : > { %v2064_v2 = vld [vmem:[#allocation9 + $0xc0] sm:$0xff]   ;;  %v380_v8 = vunpack.c.l.bf16 %v379_v7  ;;  %p2255_p13 = pnand %p2254_p9, %p2248_p11 }
  0x79   : > { %613 = vmatpush1.bf16.msra.mxu0 %v2017_v23  ;;  %686 = vmatpush1.bf16.msra.mxu1 %v2018_v24  ;;  %v2065_v3 = vld [vmem:[#allocation9] sm:$0xff]  }
  0x7a   : > { %614 = vmatprep.subr.bf16.mxu0 %v2019_v25  ;;  %687 = vmatprep.subr.bf16.mxu1 %v2021_v26  ;;  %v2066_v4 = vld [vmem:[#allocation9 + $0x80] sm:$0xff]   ;;  %v385_v13 = vrot.slane %v380_v8, %v2545_v9  ;;  %v393_v14 = vrot.slane %v380_v8, %v392_v10  ;;  %v389_v15 = vrot.slane %v380_v8, %v388_v11 }
  0x7b   : > { %v397_v16 = vrot.slane %v380_v8, %v396_v12 }
  0x7c   : > { %v2549_v17 = vrot.slane %v385_v13, %v2545_v9  ;;  %v2552_v18 = vrot.slane %v393_v14, %v2545_v9  ;;  %v2555_v19 = vrot.slane %v389_v15, %v2545_v9 }
  0x7d   : > { %615 = vmatpush1.bf16.msra.mxu0 %v2023_v27  ;;  %688 = vmatpush1.bf16.msra.mxu1 %v2024_v28  ;;  %v2558_v20 = vrot.slane %v397_v16, %v2545_v9 }
  0x7e   : > { %616 = vmatprep.subr.bf16.mxu0 %v2025_v29  ;;  %689 = vmatprep.subr.bf16.mxu1 %v2027_v30 }
  0x81   : > { %617 = vmatpush1.bf16.msra.mxu0 %v2029_v31  ;;  %690 = vmatpush1.bf16.msra.mxu1 %v2030_v32 }
  0x82   : > { %1803 = vmatprep.subr.bf16.mxu0 %v2035_v37  ;;  %1843 = vmatprep.subr.bf16.mxu1 %v2036_v38 }
  0x84   : > { %635 = vmatmul.mubr.bf16.vlgmr.msra.gmra.mxu0 %v339_v33  ;;  %708 = vmatmul.mubr.bf16.vlgmr.msra.gmra.mxu1 %v339_v33 }
  0x85   : > { %644 = vmatprep.mubr.bf16.mxu0 %v2343_v0  ;;  %717 = vmatprep.mubr.bf16.mxu1 %v2343_v0 }
  0x86   : > { %1804 = vmatpush3.bf16.msra.mxu0 %v2037_v39  ;;  %1844 = vmatpush3.bf16.msra.mxu1 %v2038_v40 }
  0x87   : > { %1805 = vmatprep.subr.bf16.mxu0 %v2039_v41  ;;  %1845 = vmatprep.subr.bf16.mxu1 %v2040_v42 }
  0x8a   : > { %1806 = vmatpush3.bf16.msra.mxu0 %v2041_v43  ;;  %1846 = vmatpush3.bf16.msra.mxu1 %v2042_v44 }
  0x8b   : > { %1807 = vmatprep.subr.bf16.mxu0 %v2043_v45  ;;  %1847 = vmatprep.subr.bf16.mxu1 %v2044_v46 }
  0x8c   : > { %645 = vmatmul.mubr.bf16.gmra.mxu0 %v341_v34  ;;  %718 = vmatmul.mubr.bf16.gmra.mxu1 %v341_v34 }
  0x8d   : > { %654 = vmatprep.mubr.bf16.mxu0 %v2343_v0  ;;  %727 = vmatprep.mubr.bf16.mxu1 %v2343_v0 }
  0x8e   : > { %1808 = vmatpush3.bf16.msra.mxu0 %v2045_v47  ;;  %1848 = vmatpush3.bf16.msra.mxu1 %v2046_v48 }
  0x8f   : > { %1809 = vmatprep.subr.bf16.mxu0 %v2047_v49  ;;  %1849 = vmatprep.subr.bf16.mxu1 %v2048_v50 }
  0x92   : > { %1810 = vmatpush3.bf16.msra.mxu0 %v2049_v51  ;;  %1850 = vmatpush3.bf16.msra.mxu1 %v2050_v52 }
  0x93   : > { %1811 = vmatprep.subr.bf16.mxu0 %v2051_v53  ;;  %1851 = vmatprep.subr.bf16.mxu1 %v2052_v54 }
  0x94   : > { %655 = vmatmul.mubr.bf16.gmra.mxu0 %v343_v35  ;;  %728 = vmatmul.mubr.bf16.gmra.mxu1 %v343_v35 }
  0x95   : > { %664 = vmatprep.mubr.bf16.mxu0 %v2343_v0  ;;  %737 = vmatprep.mubr.bf16.mxu1 %v2343_v0  ;;  %v2062_v0 = vld [vmem:[#allocation9 + $0x88] sm:$0xff]  }
  0x96   : > { %1812 = vmatpush3.bf16.msra.mxu0 %v2053_v55  ;;  %1852 = vmatpush3.bf16.msra.mxu1 %v2054_v56 }
  0x97   : > { %1813 = vmatprep.subr.bf16.mxu0 %v2055_v57  ;;  %1853 = vmatprep.subr.bf16.mxu1 %v2056_v58 }
  0x9a   : > { %1814 = vmatpush3.bf16.msra.mxu0 %v2057_v59  ;;  %1854 = vmatpush3.bf16.msra.mxu1 %v2058_v60 }
  0x9b   : > { %1815 = vmatprep.subr.bf16.mxu0 %v2059_v61  ;;  %1855 = vmatprep.subr.bf16.mxu1 %v2060_v62 }
  0x9c   : > { %665 = vmatmul.mubr.bf16.gmra.mxu0 %v345_v36  ;;  %738 = vmatmul.mubr.bf16.gmra.mxu1 %v345_v36 }
  0x9e   : > { %1816 = vmatpush3.bf16.msra.mxu0 %v2061_v63  ;;  %1856 = vmatpush3.bf16.msra.mxu1 %v2062_v0 }
  0x9f   : > { %1817 = vmatprep.subr.bf16.mxu0 %v2063_v1  ;;  %1857 = vmatprep.subr.bf16.mxu1 %v2064_v2 }
  0xa2   : > { %1818 = vmatpush3.bf16.msra.mxu0 %v2065_v3  ;;  %1858 = vmatpush3.bf16.msra.mxu1 %v2066_v4 }
 0x144   : > { %v636_v21 = vpop.f32.mrf.mxu0  ;;  %v709_v22 = vpop.f32.mrf.mxu1 }
 0x145   : > { %v2561_v23 = vadd.f32 %v636_v21, %v2549_v17  ;;  %v2564_v24 = vadd.f32 %v709_v22, %v2552_v18 }
 0x146   : > { %v638_v25 = vpop.f32.mrf.mxu0  ;;  %v711_v26 = vpop.f32.mrf.mxu1 }
 0x147   : > { %v748_v27 = vmul.f32 %v2561_v23, %v2561_v23  ;;  %v750_v28 = vmul.f32 %v2564_v24, %v2564_v24  ;;  %v2571_v29 = vadd.f32 %v638_v25, %v2555_v19  ;;  %v2574_v30 = vadd.f32 %v711_v26, %v2558_v20 }
 0x148   : > { %v640_v31 = vpop.f32.mrf.mxu0  ;;  %v713_v32 = vpop.f32.mrf.mxu1 }
 0x149   : > { %v780_v33 = vmul.f32 %v748_v27, %v2561_v23  ;;  %v782_v34 = vmul.f32 %v750_v28, %v2564_v24  ;;  %v749_v35 = vmul.f32 %v2571_v29, %v2571_v29  ;;  %v751_v36 = vmul.f32 %v2574_v30, %v2574_v30 }
 0x14a   : > { %v2583_v37 = vadd.f32 %v640_v31, %v2549_v17  ;;  %v2586_v38 = vadd.f32 %v713_v32, %v2552_v18  ;;  %v642_v39 = vpop.f32.mrf.mxu0  ;;  %v715_v40 = vpop.f32.mrf.mxu1 }
 0x14b   : > { %v812_v41 = vmul.f32 0.044715, %v780_v33  ;;  %v814_v42 = vmul.f32 0.044715, %v782_v34  ;;  %v781_v43 = vmul.f32 %v749_v35, %v2571_v29  ;;  %v783_v44 = vmul.f32 %v751_v36, %v2574_v30 }
 0x14c   : > { %v752_v45 = vmul.f32 %v2583_v37, %v2583_v37  ;;  %v754_v46 = vmul.f32 %v2586_v38, %v2586_v38  ;;  %v2595_v47 = vadd.f32 %v642_v39, %v2555_v19  ;;  %v2598_v48 = vadd.f32 %v715_v40, %v2558_v20  ;;  %v646_v49 = vpop.f32.mrf.mxu0  ;;  %v719_v50 = vpop.f32.mrf.mxu1 }
 0x14d   : > { %v844_v51 = vadd.f32 %v812_v41, %v2561_v23  ;;  %v846_v52 = vadd.f32 %v814_v42, %v2564_v24  ;;  %v813_v53 = vmul.f32 0.044715, %v781_v43  ;;  %v815_v54 = vmul.f32 0.044715, %v783_v44 }
 0x14e   : > { %v784_v55 = vmul.f32 %v752_v45, %v2583_v37  ;;  %v786_v56 = vmul.f32 %v754_v46, %v2586_v38  ;;  %v753_v57 = vmul.f32 %v2595_v47, %v2595_v47  ;;  %v755_v58 = vmul.f32 %v2598_v48, %v2598_v48  ;;  %v648_v63 = vpop.f32.mrf.mxu0  ;;  %v721_v4 = vpop.f32.mrf.mxu1 }
 0x14f   : > { %v876_v59 = vmul.f32 0.7978846, %v844_v51  ;;  %v878_v60 = vmul.f32 0.7978846, %v846_v52  ;;  %v845_v61 = vadd.f32 %v813_v53, %v2571_v29  ;;  %v847_v62 = vadd.f32 %v815_v54, %v2574_v30 }
 0x150   : > { %v816_v0 = vmul.f32 0.044715, %v784_v55  ;;  %v818_v1 = vmul.f32 0.044715, %v786_v56  ;;  %v785_v2 = vmul.f32 %v753_v57, %v2595_v47  ;;  %v787_v3 = vmul.f32 %v755_v58, %v2598_v48  ;;  %v650_v15 = vpop.f32.mrf.mxu0  ;;  %v723_v25 = vpop.f32.mrf.mxu1 }
 0x151   : > { %2071 = vtanh.f32 %v876_v59  ;;  %v877_v5 = vmul.f32 0.7978846, %v845_v61  ;;  %v879_v6 = vmul.f32 0.7978846, %v847_v62  ;;  %v2613_v7 = vadd.f32 %v646_v49, %v2549_v17 }
 0x152   : > { %2073 = vtanh.f32 %v878_v60  ;;  %v848_v8 = vadd.f32 %v816_v0, %v2583_v37  ;;  %v850_v10 = vadd.f32 %v818_v1, %v2586_v38  ;;  %v817_v11 = vmul.f32 0.044715, %v785_v2  ;;  %v652_v40 = vpop.f32.mrf.mxu0  ;;  %v725_v44 = vpop.f32.mrf.mxu1 }
 0x153   : > { %2075 = vtanh.f32 %v877_v5  ;;  %v819_v12 = vmul.f32 0.044715, %v787_v3  ;;  %v756_v13 = vmul.f32 %v2613_v7, %v2613_v7  ;;  %v2620_v14 = vadd.f32 %v719_v50, %v2552_v18 }
 0x154   : > { %2077 = vtanh.f32 %v879_v6  ;;  %v880_v16 = vmul.f32 0.7978846, %v848_v8  ;;  %v882_v21 = vmul.f32 0.7978846, %v850_v10  ;;  %v849_v22 = vadd.f32 %v817_v11, %v2595_v47  ;;  %v656_v58 = vpop.f32.mrf.mxu0 }
 0x155   : > { %v851_v26 = vadd.f32 %v819_v12, %v2598_v48  ;;  %v788_v27 = vmul.f32 %v756_v13, %v2613_v7  ;;  %v758_v28 = vmul.f32 %v2620_v14, %v2620_v14  ;;  %v2628_v31 = vadd.f32 %v648_v63, %v2555_v19  ;;  %v729_v63 = vpop.f32.mrf.mxu1 }
 0x156   : > { %2079 = vtanh.f32 %v880_v16  ;;  %v881_v32 = vmul.f32 0.7978846, %v849_v22  ;;  %v2631_v33 = vadd.f32 %v721_v4, %v2558_v20  ;;  %v2634_v34 = vadd.f32 %v650_v15, %v2549_v17  ;;  %v658_v15 = vpop.f32.mrf.mxu0 }
 0x157   : > { %2081 = vtanh.f32 %v882_v21  ;;  %v883_v35 = vmul.f32 0.7978846, %v851_v26  ;;  %v820_v36 = vmul.f32 0.044715, %v788_v27  ;;  %v790_v39 = vmul.f32 %v758_v28, %v2620_v14  ;;  %v731_v27 = vpop.f32.mrf.mxu1 }
 0x158   : > { %2083 = vtanh.f32 %v881_v32  ;;  %v757_v41 = vmul.f32 %v2628_v31, %v2628_v31  ;;  %v759_v42 = vmul.f32 %v2631_v33, %v2631_v33  ;;  %v760_v43 = vmul.f32 %v2634_v34, %v2634_v34 }
 0x159   : > { %2085 = vtanh.f32 %v883_v35  ;;  %v852_v45 = vadd.f32 %v820_v36, %v2613_v7  ;;  %v822_v46 = vmul.f32 0.044715, %v790_v39  ;;  %v2645_v49 = vadd.f32 %v723_v25, %v2552_v18 }
 0x15a   : > { %v789_v50 = vmul.f32 %v757_v41, %v2628_v31  ;;  %v791_v51 = vmul.f32 %v759_v42, %v2631_v33  ;;  %v792_v52 = vmul.f32 %v760_v43, %v2634_v34  ;;  %v2651_v53 = vadd.f32 %v652_v40, %v2555_v19 }
 0x15b   : > { %v884_v54 = vmul.f32 0.7978846, %v852_v45  ;;  %v854_v55 = vadd.f32 %v822_v46, %v2620_v14  ;;  %v762_v56 = vmul.f32 %v2645_v49, %v2645_v49  ;;  %v2657_v57 = vadd.f32 %v725_v44, %v2558_v20 }
 0x15c   : > { %v821_v59 = vmul.f32 0.044715, %v789_v50  ;;  %v823_v60 = vmul.f32 0.044715, %v791_v51  ;;  %v824_v61 = vmul.f32 0.044715, %v792_v52  ;;  %v761_v62 = vmul.f32 %v2651_v53, %v2651_v53  ;;  %v660_v50 = vpop.f32.mrf.mxu0 }
 0x15d   : > { %2087 = vtanh.f32 %v884_v54  ;;  %v886_v0 = vmul.f32 0.7978846, %v854_v55  ;;  %v794_v1 = vmul.f32 %v762_v56, %v2645_v49  ;;  %v763_v2 = vmul.f32 %v2657_v57, %v2657_v57  ;;  %v733_v56 = vpop.f32.mrf.mxu1 }
 0x15e   : > { %v2072_v3 = vpop.eup %2071  ;;  %v853_v4 = vadd.f32 %v821_v59, %v2628_v31  ;;  %v855_v5 = vadd.f32 %v823_v60, %v2631_v33  ;;  %v856_v6 = vadd.f32 %v824_v61, %v2634_v34  ;;  %v793_v8 = vmul.f32 %v761_v62, %v2651_v53 }
 0x15f   : > { %v2074_v10 = vpop.eup %2073  ;;  %v940_v11 = vadd.f32 1.0, %v2072_v3  ;;  %2089 = vtanh.f32 %v886_v0  ;;  %v826_v12 = vmul.f32 0.044715, %v794_v1  ;;  %v795_v13 = vmul.f32 %v763_v2, %v2657_v57 }
 0x160   : > { %v2669_v16 = vpop.eup %2075  ;;  %v942_v21 = vadd.f32 1.0, %v2074_v10  ;;  %v885_v22 = vmul.f32 0.7978846, %v853_v4  ;;  %v887_v25 = vmul.f32 0.7978846, %v855_v5  ;;  %v2672_v26 = vadd.f32 %v656_v58, %v2549_v17  ;;  %v662_v5 = vpop.f32.mrf.mxu0 }
 0x161   : > { %v2674_v28 = vpop.eup %2077  ;;  %v972_v32 = vmul.f32 0.5, %v940_v11  ;;  %v888_v35 = vmul.f32 0.7978846, %v856_v6  ;;  %v858_v36 = vadd.f32 %v826_v12, %v2645_v49  ;;  %v825_v39 = vmul.f32 0.044715, %v793_v8  ;;  %v735_v10 = vpop.f32.mrf.mxu1 }
 0x162   : > { %v974_v40 = vmul.f32 0.5, %v942_v21  ;;  %2091 = vtanh.f32 %v885_v22  ;;  %v827_v41 = vmul.f32 0.044715, %v795_v13  ;;  %v764_v42 = vmul.f32 %v2672_v26, %v2672_v26 }
 0x163   : > { %v2080_v43 = vpop.eup %2079  ;;  %v2680_v44 = vmul.f32 %v972_v32, %v2561_v23  ;;  %2093 = vtanh.f32 %v887_v25  ;;  %v890_v45 = vmul.f32 0.7978846, %v858_v36  ;;  %v857_v46 = vadd.f32 %v825_v39, %v2651_v53  ;;  %v666_v39 = vpop.f32.mrf.mxu0 }
 0x164   : > { %v2082_v51 = vpop.eup %2081  ;;  %v2684_v52 = vmul.f32 %v974_v40, %v2564_v24  ;;  %v944_v54 = vadd.f32 1.0, %v2080_v43  ;;  %2095 = vtanh.f32 %v888_v35  ;;  %v859_v55 = vadd.f32 %v827_v41, %v2657_v57 }
 0x165   : > { %v2687_v58 = vpop.eup %2083  ;;  %v946_v59 = vadd.f32 1.0, %v2082_v51  ;;  %2097 = vtanh.f32 %v890_v45  ;;  %v889_v23 = vmul.f32 0.7978846, %v857_v46  ;;  %v796_v60 = vmul.f32 %v764_v42, %v2672_v26  ;;  %v739_v46 = vpop.f32.mrf.mxu1 }
 0x166   : > { %v2690_v61 = vpop.eup %2085  ;;  %v976_v62 = vmul.f32 0.5, %v944_v54  ;;  %v891_v0 = vmul.f32 0.7978846, %v859_v55  ;;  %v2693_v1 = vadd.f32 %v729_v63, %v2552_v18  ;;  %v2696_v24 = vadd.f32 %v658_v15, %v2555_v19 }
 0x167   : > { %v978_v2 = vmul.f32 0.5, %v946_v59  ;;  %2099 = vtanh.f32 %v889_v23  ;;  %v828_v3 = vmul.f32 0.044715, %v796_v60  ;;  %v2699_v4 = vadd.f32 %v731_v27, %v2558_v20 }
 0x168   : > { %v2702_v6 = vmul.f32 %v976_v62, %v2583_v37  ;;  %2101 = vtanh.f32 %v891_v0  ;;  %v766_v8 = vmul.f32 %v2693_v1, %v2693_v1  ;;  %v765_v63 = vmul.f32 %v2696_v24, %v2696_v24 }
 0x169   : > { %v2709_v11 = vmul.f32 %v978_v2, %v2586_v38  ;;  %v860_v12 = vadd.f32 %v828_v3, %v2672_v26  ;;  %v767_v13 = vmul.f32 %v2699_v4, %v2699_v4  ;;  %v2715_v15 = vadd.f32 %v660_v50, %v2549_v17 }
 0x16a   : > { %v2717_v37 = vpop.eup %2087  ;;  %v798_v22 = vmul.f32 %v766_v8, %v2693_v1  ;;  %v797_v25 = vmul.f32 %v765_v63, %v2696_v24  ;;  %v2724_v38 = vadd.f32 %v733_v56, %v2552_v18  ;;  %v2736_v45 = vadd.f32 %v662_v5, %v2555_v19  ;;  %v668_v5 = vpop.f32.mrf.mxu0 }
 0x16b   : > { %v892_v32 = vmul.f32 0.7978846, %v860_v12  ;;  %v799_v35 = vmul.f32 %v767_v13, %v2699_v4  ;;  %v768_v36 = vmul.f32 %v2715_v15, %v2715_v15  ;;  %v2740_v54 = vadd.f32 %v735_v10, %v2558_v20 }
 0x16c   : > { %v2731_v40 = vpop.eup %2089  ;;  %v830_v41 = vmul.f32 0.044715, %v798_v22  ;;  %v829_v42 = vmul.f32 0.044715, %v797_v25  ;;  %v770_v43 = vmul.f32 %v2724_v38, %v2724_v38  ;;  %v769_v23 = vmul.f32 %v2736_v45, %v2736_v45  ;;  %v741_v22 = vpop.f32.mrf.mxu1 }
 0x16d   : > { %2103 = vtanh.f32 %v892_v32  ;;  %v831_v50 = vmul.f32 0.044715, %v799_v35  ;;  %v800_v51 = vmul.f32 %v768_v36, %v2715_v15  ;;  %v771_v2 = vmul.f32 %v2740_v54, %v2740_v54 }
 0x16e   : > { %v862_v55 = vadd.f32 %v830_v41, %v2693_v1  ;;  %v861_v56 = vadd.f32 %v829_v42, %v2696_v24  ;;  %v802_v59 = vmul.f32 %v770_v43, %v2724_v38  ;;  %v2753_v3 = vadd.f32 %v666_v39, %v2549_v17 }
 0x16f   : > { %v2747_v60 = vpop.eup %2091  ;;  %v863_v62 = vadd.f32 %v831_v50, %v2699_v4  ;;  %v832_v0 = vmul.f32 0.044715, %v800_v51  ;;  %v801_v13 = vmul.f32 %v769_v23, %v2736_v45  ;;  %v803_v36 = vmul.f32 %v771_v2, %v2740_v54 }
 0x170   : > { %3003 = vst [vmem:[#allocation17_spill] sm:$0xff] %v2753_v3  ;;  %v2755_v8 = vpop.eup %2093  ;;  %v894_v63 = vmul.f32 0.7978846, %v862_v55  ;;  %v893_v10 = vmul.f32 0.7978846, %v861_v56  ;;  %v772_v39 = vmul.f32 %v2753_v3, %v2753_v3  ;;  %v2768_v50 = vadd.f32 %v739_v46, %v2552_v18 }
 0x171   : > { %v834_v12 = vmul.f32 0.044715, %v802_v59  ;;  %v2758_v25 = vpop.eup %2095  ;;  %v895_v32 = vmul.f32 0.7978846, %v863_v62  ;;  %v864_v35 = vadd.f32 %v832_v0, %v2715_v15  ;;  %v833_v43 = vmul.f32 0.044715, %v801_v13  ;;  %v670_v59 = vpop.f32.mrf.mxu0 }
 0x172   : > { %v2764_v41 = vpop.eup %2097  ;;  %2105 = vtanh.f32 %v894_v63  ;;  %3004 = vst [vmem:[#allocation18_spill] sm:$0xff] %v2768_v50  ;;  %v835_v55 = vmul.f32 0.044715, %v803_v36  ;;  %v804_v56 = vmul.f32 %v772_v39, %v2753_v3  ;;  %v774_v2 = vmul.f32 %v2768_v50, %v2768_v50  ;;  %v743_v63 = vpop.f32.mrf.mxu1 }
 0x173   : > { %v866_v42 = vadd.f32 %v834_v12, %v2724_v38  ;;  %2107 = vtanh.f32 %v893_v10  ;;  %v896_v51 = vmul.f32 0.7978846, %v864_v35  ;;  %v865_v0 = vadd.f32 %v833_v43, %v2736_v45 }
 0x174   : > { %v2771_v23 = vpop.eup %2099  ;;  %2109 = vtanh.f32 %v895_v32  ;;  %v867_v46 = vadd.f32 %v835_v55, %v2740_v54  ;;  %v836_v10 = vmul.f32 0.044715, %v804_v56  ;;  %v2780_v13 = vadd.f32 %v668_v5, %v2555_v19  ;;  %v672_v55 = vpop.f32.mrf.mxu0 }
 0x175   : > { %v898_v62 = vmul.f32 0.7978846, %v866_v42  ;;  %v2776_v12 = vpop.eup %2101  ;;  %2111 = vtanh.f32 %v896_v51  ;;  %v897_v35 = vmul.f32 0.7978846, %v865_v0  ;;  %v806_v32 = vmul.f32 %v774_v2, %v2768_v50 }
 0x176   : > { %v2784_v36 = vadd.f32 %v741_v22, %v2558_v20  ;;  %v899_v39 = vmul.f32 0.7978846, %v867_v46  ;;  %v868_v42 = vadd.f32 %v836_v10, %v2753_v3  ;;  %v773_v43 = vmul.f32 %v2780_v13, %v2780_v13  ;;  %v745_v22 = vpop.f32.mrf.mxu1 }
 0x177   : > { %2113 = vtanh.f32 %v898_v62  ;;  %v2790_v51 = vadd.f32 %v670_v59, %v2549_v17  ;;  %v838_v5 = vmul.f32 0.044715, %v806_v32  ;;  %v2795_v62 = vadd.f32 %v743_v63, %v2552_v18 }
 0x178   : > { %2115 = vtanh.f32 %v897_v35  ;;  %v775_v56 = vmul.f32 %v2784_v36, %v2784_v36  ;;  %v900_v0 = vmul.f32 0.7978846, %v868_v42  ;;  %v805_v2 = vmul.f32 %v773_v43, %v2780_v13 }
 0x179   : > { %2117 = vtanh.f32 %v899_v39  ;;  %v776_v46 = vmul.f32 %v2790_v51, %v2790_v51  ;;  %v870_v17 = vadd.f32 %v838_v5, %v2768_v50  ;;  %v778_v35 = vmul.f32 %v2795_v62, %v2795_v62 }
 0x17a   : > { %v2800_v10 = vpop.eup %2103  ;;  %v807_v59 = vmul.f32 %v775_v56, %v2784_v36  ;;  %v2807_v18 = vadd.f32 %v672_v55, %v2555_v19  ;;  %2119 = vtanh.f32 %v900_v0  ;;  %v837_v63 = vmul.f32 0.044715, %v805_v2 }
 0x17b   : > { %v808_v32 = vmul.f32 %v776_v46, %v2790_v51  ;;  %v2811_v39 = vadd.f32 %v745_v22, %v2558_v20  ;;  %v902_v42 = vmul.f32 0.7978846, %v870_v17  ;;  %v810_v27 = vmul.f32 %v778_v35, %v2795_v62 }
 0x17c   : > { %v839_v43 = vmul.f32 0.044715, %v807_v59  ;;  %v777_v5 = vmul.f32 %v2807_v18, %v2807_v18  ;;  %v869_v56 = vadd.f32 %v837_v63, %v2780_v13  ;;  %v941_v55 = vadd.f32 1.0, %v2669_v16 }
 0x17d   : > { %v840_v21 = vmul.f32 0.044715, %v808_v32  ;;  %v779_v19 = vmul.f32 %v2811_v39, %v2811_v39  ;;  %2121 = vtanh.f32 %v902_v42  ;;  %v842_v20 = vmul.f32 0.044715, %v810_v27 }
 0x17e   : > { %v871_v0 = vadd.f32 %v839_v43, %v2784_v36  ;;  %v809_v22 = vmul.f32 %v777_v5, %v2807_v18  ;;  %v901_v46 = vmul.f32 0.7978846, %v869_v56  ;;  %v945_v35 = vadd.f32 1.0, %v2687_v58 }
 0x17f   : > { %v2822_v2 = vpop.eup %2105  ;;  %v872_v17 = vadd.f32 %v840_v21, %v2790_v51  ;;  %v811_v59 = vmul.f32 %v779_v19, %v2811_v39  ;;  %v874_v9 = vadd.f32 %v842_v20, %v2795_v62  ;;  %v973_v42 = vmul.f32 0.5, %v941_v55 }
 0x180   : > { %v2108_v63 = vpop.eup %2107  ;;  %v903_v32 = vmul.f32 0.7978846, %v871_v0  ;;  %v841_v16 = vmul.f32 0.044715, %v809_v22  ;;  %2123 = vtanh.f32 %v901_v46  ;;  %v977_v5 = vmul.f32 0.5, %v945_v35 }
 0x181   : > { %v2828_v50 = vpop.eup %2109  ;;  %v904_v27 = vmul.f32 0.7978846, %v872_v17  ;;  %v843_v43 = vmul.f32 0.044715, %v811_v59  ;;  %v906_v21 = vmul.f32 0.7978846, %v874_v9  ;;  %v1005_v58 = vmul.f32 %v973_v42, %v2571_v29 }
 0x182   : > { %v2830_v3 = vpop.eup %2111  ;;  %2125 = vtanh.f32 %v903_v32  ;;  %v873_v56 = vadd.f32 %v841_v16, %v2807_v18  ;;  %v1009_v55 = vmul.f32 %v977_v5, %v2595_v47  ;;  %v943_v20 = vadd.f32 1.0, %v2674_v28 }
 0x183   : > { %2127 = vtanh.f32 %v904_v27  ;;  %v875_v0 = vadd.f32 %v843_v43, %v2811_v39  ;;  %v947_v46 = vadd.f32 1.0, %v2690_v61  ;;  %v949_v17 = vadd.f32 1.0, %v2747_v60 }
 0x184   : > { %v2834_v19 = vpop.eup %2113  ;;  %2129 = vtanh.f32 %v906_v21  ;;  %v905_v22 = vmul.f32 0.7978846, %v873_v56  ;;  %v1045_v35 = vpack.c.bf16 %v1009_v55, %v1005_v58  ;;  %v975_v32 = vmul.f32 0.5, %v943_v20 }
 0x185   : > { %v2116_v9 = vpop.eup %2115  ;;  %v907_v59 = vmul.f32 0.7978846, %v875_v0  ;;  %v953_v29 = vadd.f32 1.0, %v2771_v23  ;;  %v979_v42 = vmul.f32 0.5, %v947_v46  ;;  %v981_v27 = vmul.f32 0.5, %v949_v17 }
 0x186   : > { %v2118_v16 = vpop.eup %2117  ;;  %2131 = vtanh.f32 %v905_v22  ;;  %v951_v47 = vadd.f32 1.0, %v2755_v8  ;;  %1348 = vmatprep.mubr.bf16.mxu0 %v1045_v35  ;;  %v1007_v28 = vmul.f32 %v975_v32, %v2574_v30  ;;  %v955_v61 = vadd.f32 1.0, %v2776_v12 }
 0x187   : > { %2133 = vtanh.f32 %v907_v59  ;;  %v985_v43 = vmul.f32 0.5, %v953_v29  ;;  %v2845_v60 = vpop.eup %2119  ;;  %v1011_v5 = vmul.f32 %v979_v42, %v2598_v48  ;;  %v3005_v23 = vpack.c.bf16 %v2702_v6, %v2680_v44 }
 0x188   : > { %v1013_v21 = vmul.f32 %v981_v27, %v2628_v31  ;;  %v983_v56 = vmul.f32 0.5, %v951_v47  ;;  %v948_v8 = vadd.f32 1.0, %v2717_v37  ;;  %v987_v0 = vmul.f32 0.5, %v955_v61 }
 0x189   : > { %1349 = vmatmul.mubr.bf16.vlgmr.msra.gmra.mxu0 %v3005_v23  ;;  %v1017_v58 = vmul.f32 %v985_v43, %v2651_v53  ;;  %v952_v30 = vadd.f32 1.0, %v2758_v25  ;;  %v950_v12 = vadd.f32 1.0, %v2731_v40  ;;  %v1047_v55 = vpack.c.bf16 %v1011_v5, %v1007_v28 }
 0x18a   : > { %v1015_v20 = vmul.f32 %v983_v56, %v2631_v33  ;;  %v980_v48 = vmul.f32 0.5, %v948_v8  ;;  %v954_v22 = vadd.f32 1.0, %v2764_v41  ;;  %v2858_v44 = vpop.eup %2121  ;;  %v1019_v31 = vmul.f32 %v987_v0, %v2657_v57 }
 0x18b   : > { %v1049_v6 = vpack.c.bf16 %v1017_v58, %v1013_v21  ;;  %v984_v46 = vmul.f32 0.5, %v952_v30  ;;  %v982_v37 = vmul.f32 0.5, %v950_v12  ;;  %1413 = vmatprep.mubr.bf16.mxu1 %v1047_v55  ;;  %v957_v25 = vadd.f32 1.0, %v2108_v63 }
 0x18c   : > { %v1012_v53 = vmul.f32 %v980_v48, %v2613_v7  ;;  %v986_v17 = vmul.f32 0.5, %v954_v22  ;;  %v961_v59 = vadd.f32 1.0, %v2116_v9  ;;  %v3006_v40 = vpack.c.bf16 %v2709_v11, %v2684_v52 }
 0x18d   : > { %1356 = vmatprep.mubr.bf16.mxu0 %v1049_v6  ;;  %v1051_v33 = vpack.c.bf16 %v1019_v31, %v1015_v20  ;;  %v1016_v41 = vmul.f32 %v984_v46, %v2634_v34  ;;  %v1014_v35 = vmul.f32 %v982_v37, %v2620_v14  ;;  %v959_v57 = vadd.f32 1.0, %v2828_v50  ;;  %v2124_v32 = vpop.eup %2123 }
 0x18e   : > { %1414 = vmatmul.mubr.bf16.vlgmr.msra.gmra.mxu1 %v3006_v40  ;;  %v1018_v29 = vmul.f32 %v986_v17, %v2645_v49  ;;  %v989_v42 = vmul.f32 0.5, %v957_v25  ;;  %v993_v7 = vmul.f32 0.5, %v961_v59  ;;  %v963_v27 = vadd.f32 1.0, %v2118_v16 }
 0x18f   : > { %v2126_v63 = vpop.eup %2125  ;;  %1421 = vmatprep.mubr.bf16.mxu1 %v1051_v33  ;;  %v1048_v9 = vpack.c.bf16 %v1016_v41, %v1012_v53  ;;  %v991_v47 = vmul.f32 0.5, %v959_v57  ;;  %v956_v52 = vadd.f32 1.0, %v2800_v10  ;;  %v960_v11 = vadd.f32 1.0, %v2830_v3 }
 0x190   : > { %v2128_v28 = vpop.eup %2127  ;;  %v1050_v34 = vpack.c.bf16 %v1018_v29, %v1014_v35  ;;  %v1021_v14 = vmul.f32 %v989_v42, %v2696_v24  ;;  %v1025_v50 = vmul.f32 %v993_v7, %v2736_v45  ;;  %v995_v43 = vmul.f32 0.5, %v963_v27 }
 0x191   : > { %v2130_v61 = vpop.eup %2129  ;;  %1357 = vmatmul.mubr.bf16.gmra.mxu0 %v1048_v9  ;;  %v1023_v49 = vmul.f32 %v991_v47, %v2699_v4  ;;  %v988_v16 = vmul.f32 0.5, %v956_v52  ;;  %v992_v5 = vmul.f32 0.5, %v960_v11  ;;  %v958_v23 = vadd.f32 1.0, %v2822_v2 }
 0x192   : > { %v1053_v21 = vpack.c.bf16 %v1025_v50, %v1021_v14  ;;  %v1027_v10 = vmul.f32 %v995_v43, %v2740_v54  ;;  %v962_v3 = vadd.f32 1.0, %v2834_v19  ;;  %v965_v56 = vadd.f32 1.0, %v2124_v32  ;;  %v3009_v50 = vld [vmem:[#allocation16_spill] sm:$0xff] }
 0x193   : > { %v2132_v8 = vpop.eup %2131  ;;  %v1020_v24 = vmul.f32 %v988_v16, %v2672_v26  ;;  %v1024_v45 = vmul.f32 %v992_v5, %v2715_v15  ;;  %v990_v58 = vmul.f32 0.5, %v958_v23  ;;  %v967_v0 = vadd.f32 1.0, %v2126_v63  ;;  %v2135_v23 = vld [vmem:[%s2519_s11] sm:$0xff]  }
 0x194   : > { %v2134_v30 = vpop.eup %2133  ;;  %1364 = vmatprep.mubr.bf16.mxu0 %v1053_v21  ;;  %v1055_v4 = vpack.c.bf16 %v1027_v10, %v1023_v49  ;;  %v994_v12 = vmul.f32 0.5, %v962_v3  ;;  %v969_v55 = vadd.f32 1.0, %v2132_v8  ;;  %v997_v20 = vmul.f32 0.5, %v965_v56 }
 0x195   : > { %v971_v2 = vadd.f32 1.0, %v2134_v30  ;;  %v999_v48 = vmul.f32 0.5, %v967_v0  ;;  %v1052_v54 = vpack.c.bf16 %v1024_v45, %v1020_v24  ;;  %v964_v22 = vadd.f32 1.0, %v2845_v60 }
 0x196   : > { %1422 = vmatmul.mubr.bf16.gmra.mxu1 %v1050_v34  ;;  %v1001_v19 = vmul.f32 0.5, %v969_v55  ;;  %v1022_v26 = vmul.f32 %v990_v58, %v2693_v1  ;;  %v1026_v15 = vmul.f32 %v994_v12, %v2724_v38  ;;  %v968_v31 = vadd.f32 1.0, %v2128_v28 }
 0x197   : > { %1429 = vmatprep.mubr.bf16.mxu1 %v1055_v4  ;;  %v1003_v6 = vmul.f32 0.5, %v971_v2  ;;  %v1029_v46 = vmul.f32 %v997_v20, %v2780_v13  ;;  %v1031_v53 = vmul.f32 %v999_v48, %v2784_v36  ;;  %v970_v17 = vadd.f32 1.0, %v2130_v61  ;;  %v3007_v13 = vld [vmem:[#allocation17_spill] sm:$0xff] }
 0x198   : > { %v1033_v37 = vmul.f32 %v1001_v19, %v2807_v18  ;;  %v996_v59 = vmul.f32 0.5, %v964_v22  ;;  %v1000_v40 = vmul.f32 0.5, %v968_v31  ;;  %v966_v60 = vadd.f32 1.0, %v2858_v44 }
 0x199   : > { %1365 = vmatmul.mubr.bf16.gmra.mxu0 %v1052_v54  ;;  %v1035_v25 = vmul.f32 %v1003_v6, %v2811_v39  ;;  %v1054_v1 = vpack.c.bf16 %v1026_v15, %v1022_v26  ;;  %v1002_v35 = vmul.f32 0.5, %v970_v17  ;;  %v3008_v39 = vld [vmem:[#allocation18_spill] sm:$0xff]  ;;  %v1487_v21 = vunpack.c.l.bf16 %v2135_v23  ;;  %v2136_v6 = vld [vmem:[%s2519_s11 + $0x8] sm:$0xff]  }
 0x19a   : > { %v1057_v33 = vpack.c.bf16 %v1033_v37, %v1029_v46  ;;  %v1032_v38 = vmul.f32 %v1000_v40, %v2790_v51  ;;  %v1028_v18 = vmul.f32 %v996_v59, %v3007_v13  ;;  %v998_v57 = vmul.f32 0.5, %v966_v60  ;;  %v1473_v51 = vld [vmem:[%s2976_s4] sm:$0x1] }
 0x19b   : > { %v1059_v41 = vpack.c.bf16 %v1035_v25, %v1031_v53  ;;  %v1034_v32 = vmul.f32 %v1002_v35, %v2795_v62  ;;  %v1474_v47 = vunpack.c.l.bf16 %v1473_v51  ;;  %v1488_v56 = vunpack.c.h.bf16 %v2135_v23 }
 0x19c   : > { %1372 = vmatprep.mubr.bf16.mxu0 %v1057_v33  ;;  %v1056_v36 = vpack.c.bf16 %v1032_v38, %v1028_v18  ;;  %v1030_v29 = vmul.f32 %v998_v57, %v3008_v39  ;;  %v1489_v31 = vunpack.c.l.bf16 %v2136_v6  ;;  %v1490_v53 = vunpack.c.h.bf16 %v2136_v6 }
 0x19d   : > { %v2895_v43 = vrot.slane %v1474_v47, %v3009_v50 }
 0x19e   : > { %1430 = vmatmul.mubr.bf16.gmra.mxu1 %v1054_v1  ;;  %v1058_v42 = vpack.c.bf16 %v1034_v32, %v1030_v29 }
 0x19f   : > { %1437 = vmatprep.mubr.bf16.mxu1 %v1059_v41 }
 0x1a1   : > { %1373 = vmatmul.mubr.bf16.gmra.mxu0 %v1056_v36 }
 0x1a6   : > { %1438 = vmatmul.mubr.bf16.gmra.mxu1 %v1058_v42  ;;  %v2137_v42 = vld [vmem:[%s2519_s11 + $0x10] sm:$0xff]  }
 0x249   : > { %v1819_v44 = vpop.f32.mrf.mxu0 }
 0x24b   : > { %v1820_v7 = vpop.f32.mrf.mxu0 }
 0x24c   : > { %v1821_v9 = vadd.f32 %v1820_v7, %v1819_v44  ;;  %v1491_v44 = vunpack.c.l.bf16 %v2137_v42 }
 0x24d   : > { %v1822_v27 = vpop.f32.mrf.mxu0 }
 0x24e   : > { %v1859_v63 = vpop.f32.mrf.mxu1 }
 0x24f   : > { %v1823_v52 = vpop.f32.mrf.mxu0 }
 0x250   : > { %v1860_v11 = vpop.f32.mrf.mxu1  ;;  %v1824_v61 = vadd.f32 %v1823_v52, %v1822_v27  ;;  %v1492_v27 = vunpack.c.h.bf16 %v2137_v42 }
 0x251   : > { %v1861_v28 = vadd.f32 %v1860_v11, %v1859_v63  ;;  %v1825_v34 = vpop.f32.mrf.mxu0 }
 0x252   : > { %v1862_v62 = vpop.f32.mrf.mxu1 }
 0x253   : > { %v1416_v14 = vadd.f32 %v1861_v28, %v1821_v9  ;;  %v1826_v16 = vpop.f32.mrf.mxu0 }
 0x254   : > { %v1863_v49 = vpop.f32.mrf.mxu1  ;;  %v1827_v45 = vadd.f32 %v1826_v16, %v1825_v34 }
 0x255   : > { %v1864_v5 = vadd.f32 %v1863_v49, %v1862_v62  ;;  %v1828_v3 = vpop.f32.mrf.mxu0  ;;  %v1479_v8 = vadd.f32 %v2895_v43, %v1416_v14 }
 0x256   : > { %v1865_v10 = vpop.f32.mrf.mxu1 }
 0x257   : > { %v1419_v24 = vadd.f32 %v1864_v5, %v1824_v61  ;;  %v1829_v0 = vpop.f32.mrf.mxu0  ;;  %v1495_v20 = vadd.f32 %v1487_v21, %v1479_v8  ;;  %v2138_v21 = vld [vmem:[%s2519_s11 + $0x18] sm:$0xff]  }
 0x258   : > { %v1866_v58 = vpop.f32.mrf.mxu1  ;;  %v1830_v54 = vadd.f32 %v1829_v0, %v1828_v3  ;;  %v1494_v3 = vunpack.c.h.bf16 %v2138_v21 }
 0x259   : > { %v1480_v30 = vadd.f32 %v2895_v43, %v1419_v24  ;;  %v1867_v4 = vadd.f32 %v1866_v58, %v1865_v10  ;;  %v1831_v55 = vpop.f32.mrf.mxu0  ;;  %v1493_v10 = vunpack.c.l.bf16 %v2138_v21 }
 0x25a   : > { %v1868_v12 = vpop.f32.mrf.mxu1 }
 0x25b   : > { %v1496_v2 = vadd.f32 %v1488_v56, %v1480_v30  ;;  %v1424_v48 = vadd.f32 %v1867_v4, %v1827_v45  ;;  %v1832_v22 = vpop.f32.mrf.mxu0 }
 0x25c   : > { %v1869_v19 = vpop.f32.mrf.mxu1  ;;  %v1833_v59 = vadd.f32 %v1832_v22, %v1831_v55 }
 0x25d   : > { %v1783_v26 = vpack.c.bf16 %v1496_v2, %v1495_v20  ;;  %v1870_v15 = vadd.f32 %v1869_v19, %v1868_v12  ;;  %v1834_v37 = vpop.f32.mrf.mxu0  ;;  %v1481_v17 = vadd.f32 %v2895_v43, %v1424_v48 }
 0x25e   : > { %v1871_v46 = vpop.f32.mrf.mxu1 }
 0x25f   : > { %1784 = vst [vmem:[%s2903_s30] sm:$0xff] %v1783_v26   ;;  %v1427_v25 = vadd.f32 %v1870_v15, %v1830_v54  ;;  %v1835_v60 = vpop.f32.mrf.mxu0  ;;  %v1497_v35 = vadd.f32 %v1489_v31, %v1481_v17 }
 0x260   : > { %v1872_v40 = vpop.f32.mrf.mxu1  ;;  %v1836_v57 = vadd.f32 %v1835_v60, %v1834_v37 }
 0x261   : > { %v1482_v33 = vadd.f32 %v2895_v43, %v1427_v25  ;;  %v1873_v1 = vadd.f32 %v1872_v40, %v1871_v46  ;;  %v1837_v38 = vpop.f32.mrf.mxu0 }
 0x262   : > { %v1874_v41 = vpop.f32.mrf.mxu1 }
 0x263   : > { %v1498_v13 = vadd.f32 %v1490_v53, %v1482_v33  ;;  %v1432_v18 = vadd.f32 %v1873_v1, %v1833_v59  ;;  %v1838_v32 = vpop.f32.mrf.mxu0 }
 0x264   : > { %v1875_v36 = vpop.f32.mrf.mxu1  ;;  %v1839_v47 = vadd.f32 %v1838_v32, %v1837_v38 }
 0x265   : > { %v1788_v39 = vpack.c.bf16 %v1498_v13, %v1497_v35  ;;  %v1876_v29 = vadd.f32 %v1875_v36, %v1874_v41  ;;  %v1840_v51 = vpop.f32.mrf.mxu0  ;;  %v1483_v63 = vadd.f32 %v2895_v43, %v1432_v18 }
 0x266   : > { %v1877_v7 = vpop.f32.mrf.mxu1 }
 0x267   : > { %1800 = vst [vmem:[%s2903_s30 + $0x8] sm:$0xff] %v1788_v39   ;;  %v1435_v9 = vadd.f32 %v1876_v29, %v1836_v57  ;;  %v1841_v11 = vpop.f32.mrf.mxu0  ;;  %v1499_v14 = vadd.f32 %v1491_v44, %v1483_v63 }
 0x268   : > { %v1878_v52 = vpop.f32.mrf.mxu1  ;;  %v1842_v49 = vadd.f32 %v1841_v11, %v1840_v51 }
 0x269   : > { %v1484_v28 = vadd.f32 %v2895_v43, %v1435_v9  ;;  %v1879_v62 = vadd.f32 %v1878_v52, %v1877_v7 }
 0x26a   : > { %v1880_v34 = vpop.f32.mrf.mxu1 }
 0x26b   : > { %v1500_v50 = vadd.f32 %v1492_v27, %v1484_v28  ;;  %v1440_v61 = vadd.f32 %v1879_v62, %v1839_v47 }
 0x26c   : > { %v1881_v16 = vpop.f32.mrf.mxu1 }
 0x26d   : > { %v1793_v5 = vpack.c.bf16 %v1500_v50, %v1499_v14  ;;  %v1882_v23 = vadd.f32 %v1881_v16, %v1880_v34  ;;  %v1485_v56 = vadd.f32 %v2895_v43, %v1440_v61 }
 0x26f   : > { %1801 = vst [vmem:[%s2903_s30 + $0x10] sm:$0xff] %v1793_v5   ;;  %v1443_v8 = vadd.f32 %v1882_v23, %v1842_v49  ;;  %v1501_v45 = vadd.f32 %v1493_v10, %v1485_v56 }
 0x271   : > { %v1486_v24 = vadd.f32 %v2895_v43, %v1443_v8 }
 0x273   : > { %v1502_v58 = vadd.f32 %v1494_v3, %v1486_v24 }
 0x275   : > { %v1798_v0 = vpack.c.bf16 %v1502_v58, %v1501_v45 }
 0x277   : > { %1802 = vst [vmem:[%s2903_s30 + $0x18] sm:$0xff] %v1798_v0  }
 0x278   : > { %2258 = shalt.err (!%p2255_p13)
}
 0x279   : > { %s2259_s1 = scalar_lea.hbm %s2921_s17, 512  ;;  %s2263_s26 = scalar_lea.hbm %s2977_s5, 1024 }
 0x27a   : > { %p2260_p1 = scmp.ne.s32.totalorder %s2921_s17, %s2259_s1  ;;  %p2264_p12 = scmp.lt.s32.totalorder %s2921_s17, %s2977_s5 }
 0x27b   : > { %p2265_p5 = scmp.lt.s32.totalorder %s2263_s26, %s2259_s1 }
 0x27c   : > { %p2261_p4 = pnand %p2260_p1, %p2480_p0 }
 0x27d   : > { %p2266_p3 = por %p2265_p5, %p2264_p12 }
 0x27e   : > { %p2262_p8 = pneg %p2261_p4 }
 0x280   : > { %p2267_p10 = pnand %p2266_p3, %p2262_p8 }
 0x282   : > { %2270 = shalt.err (!%p2267_p10)
}
 0x283   : > { %s2345_s9 = smov 64   ;;  %s2346_s27 = smov 4  }
 0x284   : > { %1897 = dma.vmem_to_hbm [thread:$0]  (%p2480_p0), %s2923_s10, 512, %s2921_s17, %s1544_s14, %s2345_s9, %s2345_s9, %s2346_s27  }
 0x285 PF: > { %s1572_s13 = sand.u32 1, %s2313_s18   ;;  %p3010_p2 = scmp.ne.s32.totalorder %s2991_s29, 0 }
 0x286   : > { %p3011_p11 = scmp.ge.s32.totalorder %s2333_s23, 2  ;;  %s1573_s24 = scalar_lea.sflag [#allocation5], %s1572_s13 }
 0x288   : > { %p1914_p7 = pnand %p3011_p11, %p3010_p2 }
 0x28a   : > { %p1915_p6 = pneg %p1914_p7 }
 0x28c   : > { %2308 = dma.done.wait (%p1915_p6), %s1573_s24, 512  }
 0x28d   : > { %2310 = vsyncadd (%p1915_p6), %s1573_s24, 4294966784  ;;  %s23_s23 = sadd.s32 1, %s2333_s23   ;;  %s3012_s18 = smov %s2317_s19 }
 0x28e   : > { %p20_p9 = scmp.ge.s32.totalorder %s23_s23, 4   ;;  %s3013_s19 = smov %s2321_s20 }
 0x28f   : > { %s3014_s20 = smov %s2492_s25  ;;  %s3015_s21 = smov %s2329_s22 }
 0x290   : > { %s3016_s22 = smov %s3018_s15  ;;  %22 = sbr.rel (!%p20_p9) target bundleno = 10 (0xa), region = 108 }
 0x295   :  { %1578 = vsyncpa [#allocation4], 1 }
 0x296   :  { %1580 = vsyncpa [#allocation4 + $0x1], 1 }
 0x297   :  { %1581 = vsyncpa [#allocation7], 1 }
 0x298   :  { %1582 = vsyncpa [#allocation10], 1 }
 0x299   :  { %1583 = vsyncpa [#allocation5], 1 }
 0x29a   :  { %1585 = vsyncpa [#allocation5 + $0x1], 1 }

</bundles_post_ra>
